<compile_context>
chip_gen: v7x
topology: tpu7x:2x2x1
jax: 0.10.0
libtpu: 0.0.40
codegen_flags: <defaults>
</compile_context>

<pallas_src>
import functools

import jax
import jax.numpy as jnp
from jax.experimental import pallas as pl
from jax.experimental.pallas import tpu as pltpu

# ---- problem sizes (consistent with the module) ----
B = 2            # batch
S = 8            # sequence length of query_input
QUERY_LEN = 32   # in_features of w_q
KEY_LEN = 16     # out_features of w_q (rows of `value`)
V_DIM = 32       # columns of `value`

SCALE_FACTOR = 1.0 / (KEY_LEN ** 0.5)
DROPOUT_P = 0.2


def _sdpa_kernel(q_ref, wt_ref, b_ref, v_ref, bits_ref, o_ref,
                 *, scale_factor, dropout_p, batch, seq):
    # ---- Linear for all B*S rows at once (bf16 MXU operands, f32 accumulate)
    q16 = q_ref[...].astype(jnp.bfloat16)            # [B*S, Q]
    w16 = wt_ref[...].astype(jnp.bfloat16)           # [Q, K]
    qk = jnp.dot(q16, w16, preferred_element_type=jnp.float32)   # [B*S, K]
    qk = qk + b_ref[...]                              # broadcast [1, K]

    # ---- scale + softmax over last dim (f32 VPU/EUP math)
    scaled = qk * scale_factor
    m = jnp.max(scaled, axis=-1, keepdims=True)
    e = jnp.exp(scaled - m)
    denom = jnp.sum(e, axis=-1, keepdims=True)
    sm = e * pl.reciprocal(denom, approx=True)        # EUP vrcp slot

    # ---- dropout: integer-threshold compare on pre-generated uniform bits
    thr = jnp.uint32(int(round(dropout_p * (1 << 32))))
    keep = bits_ref[...] >= thr                        # P(keep) = 1 - p
    dropped = jnp.where(keep, sm * (1.0 / (1.0 - dropout_p)), 0.0)

    # ---- second matmul with value, unrolled over the tiny batch dim
    d16 = dropped.astype(jnp.bfloat16)                 # [B*S, K]
    v16 = v_ref[...].astype(jnp.bfloat16)              # [B, K, V]
    for b in range(batch):
        o_ref[b * seq:(b + 1) * seq, :] = jnp.dot(
            d16[b * seq:(b + 1) * seq, :], v16[b],
            preferred_element_type=jnp.float32).astype(o_ref.dtype)


def sdpa_forward(query_input, w_t, bias, value, dropout_bits,
                 *, scale_factor=SCALE_FACTOR, dropout_p=DROPOUT_P):
    B_, S_, Q_ = query_input.shape
    K_ = w_t.shape[1]
    V_ = value.shape[2]

    # Flatten batch*seq so the linear is one [B*S, Q] @ [Q, K] dot.
    q2d = query_input.reshape(B_ * S_, Q_)

    kernel = functools.partial(
        _sdpa_kernel,
        scale_factor=scale_factor,
        dropout_p=dropout_p,
        batch=B_,
        seq=S_,
    )

    out2d = pl.pallas_call(
        kernel,
        out_shape=jax.ShapeDtypeStruct((B_ * S_, V_), jnp.float32),
        in_specs=[
            pl.BlockSpec(memory_space=pltpu.MemorySpace.VMEM),   # query (flat)
            pl.BlockSpec(memory_space=pltpu.MemorySpace.VMEM),   # W^T
            pl.BlockSpec(memory_space=pltpu.MemorySpace.VMEM),   # bias
            pl.BlockSpec(memory_space=pltpu.MemorySpace.VMEM),   # value
            pl.BlockSpec(memory_space=pltpu.MemorySpace.VMEM),   # dropout bits
        ],
        out_specs=pl.BlockSpec(memory_space=pltpu.MemorySpace.VMEM),
    )(q2d, w_t, bias, value, dropout_bits)

    return out2d.reshape(B_, S_, V_)


if __name__ == "__main__":
    key = jax.random.PRNGKey(0)
    k_q, k_w, k_b, k_v, k_d = jax.random.split(key, 5)

    # Deterministic "parameters" for w_q (Linear(QUERY_LEN, KEY_LEN))
    w = jax.random.normal(k_w, (KEY_LEN, QUERY_LEN), jnp.float32) * 0.1
    bias = jax.random.normal(k_b, (1, KEY_LEN), jnp.float32) * 0.1
    w_t = w.T  # [QUERY_LEN, KEY_LEN]

    # Inputs
    query_input = jax.random.normal(k_q, (B, S, QUERY_LEN), jnp.float32)
    value = jax.random.normal(k_v, (B, KEY_LEN, V_DIM), jnp.float32)

    # One uniform u32 draw covering the whole dropout mask (training-mode
    # dropout semantics: keep w.p. 1-p, rescale by 1/(1-p)).
    dropout_bits = jax.random.bits(k_d, (B * S, KEY_LEN), dtype=jnp.uint32)

    out = sdpa_forward(query_input, w_t, bias, value, dropout_bits)
    out = jax.block_until_ready(out)

    assert out.shape == (B, S, V_DIM), out.shape
    assert jnp.isfinite(out).all()
    print("KERNEL_OK")
</pallas_src>

<mosaic_0001>
module attributes {stable_mosaic.version = 11 : i64} {
  func.func @_sdpa_kernel(%arg0: memref<16x32xf32, #tpu.memory_space<vmem>>, %arg1: memref<32x16xf32, #tpu.memory_space<vmem>>, %arg2: memref<1x16xf32, #tpu.memory_space<vmem>>, %arg3: memref<2x16x32xf32, #tpu.memory_space<vmem>>, %arg4: memref<16x16xi32, #tpu.memory_space<vmem>>, %arg5: memref<16x32xf32, #tpu.memory_space<vmem>>) attributes {dimension_semantics = [], scalar_prefetch = 0 : i64, scratch_operands = 0 : i64, tpu.core_type = #tpu.core_type<tc>} {
    %c0 = arith.constant 0 : index
    %c0_0 = arith.constant 0 : index
    %0 = vector.load %arg0[%c0, %c0_0] : memref<16x32xf32, #tpu.memory_space<vmem>>, vector<16x32xf32>
    %1 = arith.truncf %0 : vector<16x32xf32> to vector<16x32xbf16>
    %c0_1 = arith.constant 0 : index
    %c0_2 = arith.constant 0 : index
    %2 = vector.load %arg1[%c0_1, %c0_2] : memref<32x16xf32, #tpu.memory_space<vmem>>, vector<32x16xf32>
    %3 = arith.truncf %2 : vector<32x16xf32> to vector<32x16xbf16>
    %cst = arith.constant dense<0.000000e+00> : vector<16x16xf32>
    %4 = tpu.matmul %1, %3, %cst {dimension_numbers = #tpu.dot_dimension_numbers<[1], [0], [0], [1], [0, 0, 1, 1], [], []>} : vector<16x32xbf16>, vector<32x16xbf16>, vector<16x16xf32> -> vector<16x16xf32>
    %c0_3 = arith.constant 0 : index
    %c0_4 = arith.constant 0 : index
    %5 = vector.load %arg2[%c0_3, %c0_4] : memref<1x16xf32, #tpu.memory_space<vmem>>, vector<1x16xf32>
    %6 = vector.broadcast %5 : vector<1x16xf32> to vector<16x16xf32>
    %7 = arith.addf %4, %6 : vector<16x16xf32>
    %cst_5 = arith.constant 2.500000e-01 : f32
    %8 = vector.broadcast %cst_5 : f32 to vector<16x16xf32>
    %9 = arith.mulf %7, %8 : vector<16x16xf32>
    %cst_6 = arith.constant dense<0xFF800000> : vector<16xf32>
    %10 = vector.multi_reduction <maximumf>, %9, %cst_6 [1] : vector<16x16xf32> to vector<16xf32>
    %11 = vector.shape_cast %10 : vector<16xf32> to vector<16x1xf32>
    %12 = vector.broadcast %11 : vector<16x1xf32> to vector<16x16xf32>
    %13 = arith.subf %9, %12 : vector<16x16xf32>
    %14 = math.exp %13 : vector<16x16xf32>
    %cst_7 = arith.constant dense<0.000000e+00> : vector<16xf32>
    %15 = vector.multi_reduction <add>, %14, %cst_7 [1] : vector<16x16xf32> to vector<16xf32>
    %16 = vector.shape_cast %15 : vector<16xf32> to vector<16x1xf32>
    %17 = tpu.reciprocal %16 {approx = true} : vector<16x1xf32> -> vector<16x1xf32>
    %18 = vector.broadcast %17 : vector<16x1xf32> to vector<16x16xf32>
    %19 = arith.mulf %14, %18 : vector<16x16xf32>
    %c0_8 = arith.constant 0 : index
    %c0_9 = arith.constant 0 : index
    %20 = vector.load %arg4[%c0_8, %c0_9] : memref<16x16xi32, #tpu.memory_space<vmem>>, vector<16x16xi32>
    %c858993459_i32 = arith.constant 858993459 : i32
    %21 = vector.broadcast %c858993459_i32 : i32 to vector<16x16xi32>
    %22 = arith.cmpi uge, %20, %21 : vector<16x16xi32>
    %cst_10 = arith.constant 1.250000e+00 : f32
    %23 = vector.broadcast %cst_10 : f32 to vector<16x16xf32>
    %24 = arith.mulf %19, %23 : vector<16x16xf32>
    %cst_11 = arith.constant 0.000000e+00 : f32
    %25 = vector.broadcast %cst_11 : f32 to vector<16x16xf32>
    %26 = arith.select %22, %24, %25 : vector<16x16xi1>, vector<16x16xf32>
    %27 = arith.truncf %26 : vector<16x16xf32> to vector<16x16xbf16>
    %c0_12 = arith.constant 0 : index
    %c0_13 = arith.constant 0 : index
    %c0_14 = arith.constant 0 : index
    %28 = vector.load %arg3[%c0_12, %c0_13, %c0_14] : memref<2x16x32xf32, #tpu.memory_space<vmem>>, vector<2x16x32xf32>
    %29 = arith.truncf %28 : vector<2x16x32xf32> to vector<2x16x32xbf16>
    %30 = vector.extract_strided_slice %27 {offsets = [0, 0], sizes = [8, 16], strides = [1, 1]} : vector<16x16xbf16> to vector<8x16xbf16>
    %31 = vector.extract_strided_slice %29 {offsets = [0, 0, 0], sizes = [1, 16, 32], strides = [1, 1, 1]} : vector<2x16x32xbf16> to vector<1x16x32xbf16>
    %32 = vector.shape_cast %31 : vector<1x16x32xbf16> to vector<16x32xbf16>
    %cst_15 = arith.constant dense<0.000000e+00> : vector<8x32xf32>
    %33 = tpu.matmul %30, %32, %cst_15 {dimension_numbers = #tpu.dot_dimension_numbers<[1], [0], [0], [1], [0, 0, 1, 1], [], []>} : vector<8x16xbf16>, vector<16x32xbf16>, vector<8x32xf32> -> vector<8x32xf32>
    %c0_16 = arith.constant 0 : index
    %c0_17 = arith.constant 0 : index
    %34 = vector.load %arg5[%c0_16, %c0_17] : memref<16x32xf32, #tpu.memory_space<vmem>>, vector<8x32xf32>
    tpu.vector_store %arg5[%c0_16, %c0_17], %33 {strides = array<i32>} : memref<16x32xf32, #tpu.memory_space<vmem>>, vector<8x32xf32>,
    %35 = vector.extract_strided_slice %27 {offsets = [8, 0], sizes = [8, 16], strides = [1, 1]} : vector<16x16xbf16> to vector<8x16xbf16>
    %36 = vector.extract_strided_slice %29 {offsets = [1, 0, 0], sizes = [1, 16, 32], strides = [1, 1, 1]} : vector<2x16x32xbf16> to vector<1x16x32xbf16>
    %37 = vector.shape_cast %36 : vector<1x16x32xbf16> to vector<16x32xbf16>
    %cst_18 = arith.constant dense<0.000000e+00> : vector<8x32xf32>
    %38 = tpu.matmul %35, %37, %cst_18 {dimension_numbers = #tpu.dot_dimension_numbers<[1], [0], [0], [1], [0, 0, 1, 1], [], []>} : vector<8x16xbf16>, vector<16x32xbf16>, vector<8x32xf32> -> vector<8x32xf32>
    %c8 = arith.constant 8 : index
    %c0_19 = arith.constant 0 : index
    %39 = vector.load %arg5[%c8, %c0_19] : memref<16x32xf32, #tpu.memory_space<vmem>>, vector<8x32xf32>
    tpu.vector_store %arg5[%c8, %c0_19], %38 {strides = array<i32>} : memref<16x32xf32, #tpu.memory_space<vmem>>, vector<8x32xf32>,
    return
  }
}

</mosaic_0001>

<bundles_post_ra>
// kernel: tpu_custom_call.1
= control target key start
LH: loop header
LB: loop body
LE: loop exit
PB: predicated region body
PF: predicated region fallthrough
CT: control target
= control target key end

     0   :  { %10 = vsyncpa [#allocation3], 0  ;;  %s455_s0 = inlined_call_operand.vmem [shape: f32[16,32], index: 0, kind: input, shape index: {}]   ;;  %s456_s1 = inlined_call_operand.vmem [shape: f32[32,16], index: 1, kind: input, shape index: {}]   ;;  %s457_s2 = inlined_call_operand.vmem [shape: f32[1,16], index: 2, kind: input, shape index: {}]   ;;  %s458_s3 = inlined_call_operand.vmem [shape: f32[2,16,32], index: 3, kind: input, shape index: {}]   ;;  %s459_s4 = inlined_call_operand.hbm [shape: u32[16,16], index: 4, kind: input, shape index: {}]   ;;  %s460_s5 = inlined_call_operand.hbm [shape: f32[16,32], index: 5, kind: output, shape index: {}]  }
   0x1   :  { %11 = vsyncpa [#allocation4], 0  ;;  %s337_s18 = smov [#allocation2]   ;;  %s289_s22 = scalar_lea.hbm %s459_s4, 256 }
   0x2   :  { %s25_s19 = sshll.u32 %s337_s18, 4  ;;  %p290_p0 = scmp.ne.s32.totalorder %s459_s4, %s289_s22  ;;  %s26_s19 = int_to_ptr.vmem [resolvable:$true] %s25_s19 }
   0x3   :  { %p293_p1 = scmp.lt.u32.totalorder %s289_s22, %s459_s4 }
   0x5   :  { %p295_p2 = pnand %p293_p1, %p290_p0 }
   0x7   :  { %298 = shalt.err (!%p295_p2)
}
   0x8   :  { %s299_s27 = scalar_lea.vmem %s26_s19, 256  ;;  %p304_p4 = scmp.lt.s32.totalorder %s26_s19, %s26_s19 }
   0x9   :  { %p300_p3 = scmp.ne.s32.totalorder %s26_s19, %s299_s27  ;;  %p305_p5 = scmp.lt.s32.totalorder %s299_s27, %s299_s27 }
   0xb   :  { %p306_p6 = por %p305_p5, %p304_p4 }
   0xd   :  { %p307_p7 = pnand %p306_p6, %p300_p3 }
   0xf   :  { %310 = shalt.err (!%p307_p7)
}
  0x10   :  { %s338_s28 = smov 128   ;;  %s339_s29 = smov 8  }
  0x11   :  { %31 = dma.hbm_to_vmem [thread:$0]  %s459_s4, 256, %s26_s19, [#allocation3], %s338_s28, %s338_s28, %s339_s29  }
  0x12   :  { %333 = dma.done.wait [#allocation3], 256  }
  0x13   :  { %334 = vsyncadd [#allocation3], 4294967040  ;;  %v340_v0 = vmov 0.0   ;;  %vm341_vm0 = vmmov 0   ;;  %v39_v1 = vld [vmem:[%s456_s1] sm:$0xff]  ;;  %v40_v2 = vld [vmem:[%s456_s1 + $0x8] sm:$0xff] }
  0x14   :  { %255 = vmatprep.subr.bf16.mxu0 %v340_v0  ;;  %259 = vmatprep.mubr.msk.bf16.mxu0 %vm341_vm0, %v340_v0  ;;  %v41_v3 = vld [vmem:[%s456_s1 + $0x10] sm:$0xff]  ;;  %v43_v4 = vpack.c.bf16 %v40_v2, %v39_v1  ;;  %v42_v5 = vld [vmem:[%s456_s1 + $0x18] sm:$0xff]  ;;  %v36_v7 = vld [vmem:[%s455_s0] sm:$0xff]  ;;  %vm52_vm1 = vcmask 261120   ;;  %vm99_vm2 = vcmask 130048  }
  0x15   :  { %263 = vmatprep.subr.bf16.mxu1 %v340_v0  ;;  %265 = vmatprep.mubr.msk.bf16.mxu1 %vm341_vm0, %v340_v0  ;;  %v44_v6 = vpack.c.bf16 %v42_v5, %v41_v3  ;;  %v37_v8 = vld [vmem:[%s455_s0 + $0x8] sm:$0xff]  ;;  %v244_v10 = vld [vmem:[%s457_s2] ss:$0 sm:$0xff]  ;;  %v133_v43 = vld [vmem:[%s458_s3 + $0x10] sm:$0xff] }
  0x16   :  { %256 = vmatpush3.bf16.msra.mxu0 %v43_v4  ;;  %v38_v9 = vpack.c.bf16 %v37_v8, %v36_v7  ;;  %v131_v31 = vld [vmem:[%s458_s3] sm:$0xff]  ;;  %v132_v32 = vld [vmem:[%s458_s3 + $0x8] sm:$0xff]  ;;  %v134_v44 = vld [vmem:[%s458_s3 + $0x18] sm:$0xff]  ;;  %s342_s3 = smov [#allocation5]  }
  0x17   :  { %257 = vmatprep.subr.bf16.mxu0 %v340_v0  ;;  %v135_v33 = vpack.c.bf16 %v132_v32, %v131_v31  ;;  %v122_v38 = vld [vmem:[#allocation2] sm:$0xff]  ;;  %v123_v39 = vld [vmem:[#allocation2 + $0x8] sm:$0xff]  ;;  %v136_v48 = vpack.c.bf16 %v134_v44, %v133_v43  ;;  %s232_s25 = sshll.u32 %s342_s3, 4  ;;  %s233_s25 = int_to_ptr.vmem [resolvable:$true] %s232_s25 }
  0x18   :  { %vm124_vm3 = vcmp.ge.u32.totalorder %v122_v38, 858993459  ;;  %vm125_vm4 = vcmp.ge.u32.totalorder %v123_v39, 858993459  ;;  %s311_s26 = scalar_lea.vmem %s233_s25, 256  ;;  %p316_p9 = scmp.lt.s32.totalorder %s233_s25, %s233_s25 }
  0x19   :  { %264 = vmatpush3.bf16.msra.mxu1 %v135_v33  ;;  %p312_p8 = scmp.ne.s32.totalorder %s233_s25, %s311_s26  ;;  %p317_p10 = scmp.lt.s32.totalorder %s311_s26, %s311_s26 }
  0x1a   :  { %258 = vmatpush3.bf16.msra.mxu0 %v44_v6  ;;  %269 = vmatprep.subr.bf16.mxu1 %v340_v0 }
  0x1b   :  { %p318_p11 = por %p317_p10, %p316_p9 }
  0x1d   :  { %260 = vmatmul.mubr.msk.bf16.vlgmr.msra.gmra.mrb[0].mxu0 %vm52_vm1, %v38_v9  ;;  %p319_p12 = pnand %p318_p11, %p312_p8 }
  0xf0   :  { %v90_v11 = vpop.f32.mrb[0].mxu0 }
  0xf1   :  { %v91_v12 = vadd.f32 %v244_v10, %v90_v11  ;;  %v261_v13 = vpop.f32.mrb[1].mxu0 }
  0xf2   :  { %v93_v14 = vpop.f32.mrb[2].mxu0 }
  0xf3   :  { %v97_v15 = vmul.f32 0.25, %v91_v12  ;;  %v94_v16 = vadd.f32 %v244_v10, %v93_v14  ;;  %v262_v17 = vpop.f32.mrb[3].mxu0 }
  0xf5   :  { %v98_v18 = vmul.f32 0.25, %v94_v16  ;;  %v100_v19 = vsel %vm99_vm2, %v97_v15, -inf }
  0xf6   :  { %101 = vmax.xlane.f32.xlu0 %v100_v19 }
  0xf7   :  { %v103_v20 = vsel %vm99_vm2, %v98_v18, -inf }
  0xfa   :  { %104 = vmax.xlane.f32.xlu0 %v103_v20 }
 0x183   :  { %v102_v21 = vpop.xlane.xlu0 %101 }
 0x184   :  { %v106_v22 = vsub.f32 %v97_v15, %v102_v21 }
 0x186   :  { %v108_v23 = vmul.f32 1.442695, %v106_v22 }
 0x187   :  { %v105_v24 = vpop.xlane.xlu0 %104 }
 0x188   :  { %281 = vpow2.f32 %v108_v23  ;;  %v107_v25 = vsub.f32 %v98_v18, %v105_v24 }
 0x18a   :  { %v110_v26 = vmul.f32 1.442695, %v107_v25 }
 0x18c   :  { %283 = vpow2.f32 %v110_v26 }
 0x192   :  { %v282_v27 = vpop.eup %281 }
 0x193   :  { %v112_v28 = vsel %vm99_vm2, %v282_v27, 0.0 }
 0x194   :  { %113 = vadd.xlane.f32.xlu1 %v112_v28 }
 0x196   :  { %v284_v29 = vpop.eup %283 }
 0x197   :  { %v115_v30 = vsel %vm99_vm2, %v284_v29, 0.0 }
 0x198   :  { %116 = vadd.xlane.f32.xlu1 %v115_v30 }
 0x221   :  { %v114_v34 = vpop.xlane.xlu1 %113 }
 0x222   :  { %285 = vrcp.f32 %v114_v34 }
 0x225   :  { %v117_v35 = vpop.xlane.xlu1 %116 }
 0x226   :  { %287 = vrcp.f32 %v117_v35 }
 0x22c   :  { %v286_v36 = vpop.eup %285 }
 0x22d   :  { %v120_v37 = vmul.f32 %v286_v36, %v282_v27 }
 0x22f   :  { %v126_v42 = vmul.f32 1.25, %v120_v37 }
 0x230   :  { %v288_v40 = vpop.eup %287 }
 0x231   :  { %v121_v41 = vmul.f32 %v288_v40, %v284_v29  ;;  %v128_v46 = vsel %vm124_vm3, %v126_v42, 0.0 }
 0x233   :  { %v127_v45 = vmul.f32 1.25, %v121_v41 }
 0x235   :  { %v129_v47 = vsel %vm125_vm4, %v127_v45, 0.0 }
 0x236   :  { %v130_v49 = vpack.c.bf16 %v129_v47, %v128_v46 }
 0x238   :  { %266 = vmatmul.mubr.msk.bf16.vlgmr.msra.gmra.mrb[0].mxu1 %vm99_vm2, %v130_v49  ;;  %v182_v50 = vrot.slane %v130_v49, 4 }
 0x239   :  { %270 = vmatpush3.bf16.msra.mxu1 %v136_v48  ;;  %271 = vmatprep.mubr.msk.bf16.mxu1 %vm341_vm0, %v340_v0 }
 0x240   :  { %272 = vmatmul.mubr.msk.bf16.vlgmr.msra.gmra.mrb[4].mxu1 %vm99_vm2, %v182_v50 }
 0x30b   :  { %v174_v51 = vpop.f32.mrb[0].mxu1 }
 0x30c   :  { %180 = vst.msk [vmem:[#allocation5] sm:$0xff] %vm52_vm1, %v174_v51  ;;  %v267_v52 = vpop.f32.mrb[1].mxu1 }
 0x30d   :  { %v177_v53 = vpop.f32.mrb[2].mxu1 }
 0x30e   :  { %v268_v54 = vpop.f32.mrb[3].mxu1 }
 0x313   :  { %v220_v55 = vpop.f32.mrb[4].mxu1 }
 0x314   :  { %226 = vst.msk [vmem:[#allocation5 + $0x8] sm:$0xff] %vm52_vm1, %v220_v55  ;;  %v273_v56 = vpop.f32.mrb[5].mxu1 }
 0x315   :  { %v223_v57 = vpop.f32.mrb[6].mxu1 }
 0x316   :  { %322 = shalt.err (!%p319_p12)
}
 0x317   :  { %s323_s6 = scalar_lea.hbm %s460_s5, 256 }
 0x318   :  { %p324_p13 = scmp.ne.s32.totalorder %s460_s5, %s323_s6  ;;  %p327_p0 = scmp.lt.u32.totalorder %s323_s6, %s460_s5 }
 0x31a   :  { %p329_p1 = pnand %p327_p0, %p324_p13 }
 0x31c   :  { %332 = shalt.err (!%p329_p1)
}
 0x31d   :  { %238 = dma.vmem_to_hbm [thread:$0]  %s233_s25, 256, %s460_s5, [#allocation4], %s338_s28, %s338_s28, %s339_s29   ;;  %v274_v58 = vpop.f32.mrb[7].mxu1 }
 0x31e   :  { %335 = dma.done.wait [#allocation4], 256  }
 0x31f   :  { %336 = vsyncadd [#allocation4], 4294967040 }
 0x320   :  { %242 = vsyncpa [#allocation3], 1 }
 0x321   :  { %243 = vsyncpa [#allocation4], 1 }

</bundles_post_ra>
